<compile_context>
chip_gen: v7x
topology: tpu7x:2x2x1
jax: 0.10.0
libtpu: 0.0.40
codegen_flags: <defaults>
</compile_context>

<pallas_src>
import jax
import jax.numpy as jnp
from jax.experimental import pallas as pl
from jax.experimental.pallas import tpu as pltpu


def _round_up(v, m):
    return (v + m - 1) // m * m


def _cdiv(a, b):
    return (a + b - 1) // b


def _pad2(a, rows, cols):
    pr, pc = rows - a.shape[0], cols - a.shape[1]
    if pr or pc:
        a = jnp.pad(a, ((0, pr), (0, pc)))
    return a


def _mlp_kernel_1d(x_ref, w1_ref, b1_ref, w2_ref, b2_ref, o_ref):
    """Single embedding tile: fused Linear -> ReLU -> Linear, h kept in vregs."""
    x = x_ref[...].astype(jnp.bfloat16)                  # in-kernel cast (x is f32 in HBM)
    h = jnp.dot(x, w1_ref[...], preferred_element_type=jnp.float32)
    h = jnp.maximum(h + b1_ref[...], 0.0)                # bias + ReLU in f32 on the VPU
    o = jnp.dot(h.astype(jnp.bfloat16), w2_ref[...],
                preferred_element_type=jnp.float32)
    o_ref[...] = (o + b2_ref[...]).astype(o_ref.dtype)   # bias add in f32, then store dtype


def _mlp_kernel_2d(x_ref, w1_ref, b1_ref, w2_ref, b2_ref, o_ref, h_ref):
    """Wide embedding head: grid = (row tiles, emb tiles).

    The hidden activation depends only on the row tile i, so it is computed
    once per row tile and cached in VMEM.
    NOTE: this is correct only because axis 1 (j) is the innermost grid axis
    and is marked "arbitrary"; h_ref is written at j == 0 and read for j > 0.
    """
    j = pl.program_id(1)

    @pl.when(j == 0)
    def _():
        x = x_ref[...].astype(jnp.bfloat16)
        h = jnp.dot(x, w1_ref[...], preferred_element_type=jnp.float32)
        h_ref[...] = jnp.maximum(h + b1_ref[...], 0.0).astype(h_ref.dtype)

    o = jnp.dot(h_ref[...], w2_ref[...], preferred_element_type=jnp.float32)
    o_ref[...] = (o + b2_ref[...]).astype(o_ref.dtype)


def speakernet_forward(data, params, *, out_dtype=jnp.float32,
                       tm_cap=None, tn_cap=None):
    """SpeakerNet.forward: flatten leading dims, run the embedding model.

    data:   (..., feat_dim) float32
    params: dict with w1 (F, H), b1 (1, H), w2 (H, E), b2 (1, E), all float32
            (nn.Linear's (out, in) weights pre-transposed to (in, out)).
    returns: (prod(leading_dims), E) out_dtype
    """
    feat = data.shape[-1]
    x = data.reshape(-1, feat)          # == data.reshape(-1, data.size()[-1])
    n = x.shape[0]

    w1, b1, w2, b2 = params["w1"], params["b1"], params["w2"], params["b2"]
    hidden = w1.shape[1]
    emb = w2.shape[1]

    # Per-generation tile caps / VMEM ceiling (v7x: 64 MiB; v5e/v6e: 128 MiB).
    try:
        vmem_cap = int(pltpu.get_tpu_info().vmem_capacity_bytes)
    except Exception:                    # unknown chip / interpret: be conservative
        vmem_cap = 64 * 1024 * 1024
    small_vmem = vmem_cap <= 64 * 1024 * 1024
    if tm_cap is None:
        tm_cap = 512 if small_vmem else 1024
    if tn_cap is None:
        tn_cap = 512 if small_vmem else 1024

    # ---- Row tiling: multiples of 8, sized from the real row count.  Aim for
    # >= 2 row tiles so the "parallel" row axis can shard across v7x's 2 TCs.
    n_pad8 = _round_up(max(n, 1), 8)
    grid_m_target = max(2, _cdiv(n_pad8, tm_cap))
    tm = min(tm_cap, _round_up(_cdiv(n_pad8, grid_m_target), 8))
    if tm >= n_pad8:                     # tiny batch: a single small tile
        tm = n_pad8
    n_pad = _round_up(n_pad8, tm)

    # ---- Lane-dense padding of the (small, DMA'd-once) weights only.
    h_pad = _round_up(hidden, 128)
    e_pad = _round_up(emb, 128)

    # ---- Embedding tiling: single-tile fast path unless the head is wide.
    if e_pad <= tn_cap:
        tn = e_pad
        single_tile = True
    else:
        tn = _round_up(tn_cap, 128)
        while e_pad % tn:
            tn -= 128
        single_tile = False

    # x stays f32 and feat-unpadded; only pad rows when the grid needs it.
    if n_pad != n:
        x = jnp.pad(x, ((0, n_pad - n), (0, 0)))
    x = x.astype(jnp.float32)

    # Weights: zero-pad to lane-dense shapes, cast MXU operands to bf16
    # (one-time, tiny); biases stay f32 for the VPU bias-add / ReLU.
    w1_p = _pad2(w1, feat, h_pad).astype(jnp.bfloat16)
    b1_p = _pad2(b1, 1, h_pad).astype(jnp.float32)
    w2_p = _pad2(w2, h_pad, e_pad).astype(jnp.bfloat16)
    b2_p = _pad2(b2, 1, e_pad).astype(jnp.float32)

    out_bytes = jnp.dtype(out_dtype).itemsize

    # VMEM budget (already counts double buffering); small headroom on top.
    vmem_bytes = (
        2 * tm * feat * 4            # x row tile (f32), double-buffered
        + 2 * feat * h_pad * 2       # w1 (bf16; constant index_map, DMA'd once)
        + 2 * h_pad * 4              # b1
        + 2 * h_pad * tn * 2         # w2 (column) tile
        + 2 * tn * 4                 # b2 (column) tile
        + 2 * tm * tn * out_bytes    # output tile
    )
    if not single_tile:
        vmem_bytes += tm * h_pad * 2  # hidden-activation scratch (bf16)
    vmem_limit = int(min(vmem_cap, vmem_bytes + 8 * 1024 * 1024))

    cost = pl.CostEstimate(
        flops=2 * n_pad * (feat * h_pad + h_pad * e_pad),
        transcendentals=0,
        bytes_accessed=(
            n_pad * (feat * 4 + e_pad * out_bytes)        # stream x in, out back
            + feat * h_pad * 2 + h_pad * e_pad * 2        # bf16 weights
            + (h_pad + e_pad) * 4                         # f32 biases
        ),
    )

    if single_tile:
        grid = (n_pad // tm,)
        in_specs = [
            pl.BlockSpec((tm, feat), lambda i: (i, 0)),       # x row tile (f32)
            pl.BlockSpec((feat, h_pad), lambda i: (0, 0)),    # w1 resident
            pl.BlockSpec((1, h_pad), lambda i: (0, 0)),       # b1
            pl.BlockSpec((h_pad, e_pad), lambda i: (0, 0)),   # w2 resident
            pl.BlockSpec((1, e_pad), lambda i: (0, 0)),       # b2
        ]
        out_specs = pl.BlockSpec((tm, e_pad), lambda i: (i, 0))
        scratch_shapes = []
        kernel = _mlp_kernel_1d
        semantics = ("parallel",)
    else:
        grid = (n_pad // tm, e_pad // tn)
        in_specs = [
            pl.BlockSpec((tm, feat), lambda i, j: (i, 0)),    # x row tile (f32)
            pl.BlockSpec((feat, h_pad), lambda i, j: (0, 0)),  # w1 resident
            pl.BlockSpec((1, h_pad), lambda i, j: (0, 0)),     # b1
            pl.BlockSpec((h_pad, tn), lambda i, j: (0, j)),    # w2 column tile
            pl.BlockSpec((1, tn), lambda i, j: (0, j)),        # b2 column tile
        ]
        out_specs = pl.BlockSpec((tm, tn), lambda i, j: (i, j))
        scratch_shapes = [pltpu.VMEM((tm, h_pad), jnp.bfloat16)]
        kernel = _mlp_kernel_2d
        # j MUST stay innermost and "arbitrary": the h scratch written at
        # j == 0 is reused for j > 0 within the same row tile.
        semantics = ("parallel", "arbitrary")

    out_pad = pl.pallas_call(
        kernel,
        out_shape=jax.ShapeDtypeStruct((n_pad, e_pad), out_dtype),
        grid_spec=pltpu.PrefetchScalarGridSpec(
            num_scalar_prefetch=0,
            grid=grid,
            in_specs=in_specs,
            out_specs=out_specs,
            scratch_shapes=scratch_shapes,
        ),
        compiler_params=pltpu.CompilerParams(
            dimension_semantics=semantics,
            vmem_limit_bytes=vmem_limit,
        ),
        cost_estimate=cost,
    )(x, w1_p, b1_p, w2_p, b2_p)

    # Zero-padded rows hold garbage (relu(b1) @ W2 + b2); never expose out_pad.
    return out_pad[:n, :emb]


def init_params(key, feat_dim, hidden, emb):
    """Deterministic synthetic init for the inner MainModel (MLP), float32."""
    k1, k2, k3, k4 = jax.random.split(key, 4)
    # torch.nn.Linear stores weight as (out, in); we keep (in, out) for x @ W.
    w1 = jax.random.uniform(k1, (feat_dim, hidden), jnp.float32, -0.1, 0.1)
    b1 = jax.random.uniform(k2, (1, hidden), jnp.float32, -0.1, 0.1)
    w2 = jax.random.uniform(k3, (hidden, emb), jnp.float32, -0.1, 0.1)
    b2 = jax.random.uniform(k4, (1, emb), jnp.float32, -0.1, 0.1)
    return {"w1": w1, "b1": b1, "w2": w2, "b2": b2}


def reference_forward(data, params):
    x = data.reshape(-1, data.shape[-1]).astype(jnp.float32)
    h = jnp.maximum(x @ params["w1"] + params["b1"], 0.0)
    return h @ params["w2"] + params["b2"]


if __name__ == "__main__":
    key = jax.random.PRNGKey(0)
    k_data, k_param, k_data2, k_param2 = jax.random.split(key, 4)

    # Primary shape: (batch=2, utterances=4, feat_dim=32) -> flattened (8, 32).
    # Exercises the single-emb-tile fast path with an adaptive (8-row) tile.
    batch, utts, feat_dim = 2, 4, 32
    hidden, emb = 64, 32
    data = jax.random.normal(k_data, (batch, utts, feat_dim), jnp.float32)
    params = init_params(k_param, feat_dim, hidden, emb)

    out = jax.block_until_ready(speakernet_forward(data, params))
    ref = reference_forward(data, params)
    assert out.shape == (batch * utts, emb)
    # bf16 MXU operands with f32 accumulation -> looser tolerance than pure f32.
    assert jnp.allclose(out, ref, atol=2e-2, rtol=2e-2), float(
        jnp.max(jnp.abs(out - ref)))

    # Secondary shape: n=12 rows (needs row padding, 2 row tiles) and emb=256
    # with tn_cap=128 to force the 2-D grid + hidden-activation-scratch path.
    data2 = jax.random.normal(k_data2, (3, 4, feat_dim), jnp.float32)
    params2 = init_params(k_param2, feat_dim, hidden, 256)
    out2 = jax.block_until_ready(
        speakernet_forward(data2, params2, tn_cap=128))
    ref2 = reference_forward(data2, params2)
    assert out2.shape == (12, 256)
    assert jnp.allclose(out2, ref2, atol=2e-2, rtol=2e-2), float(
        jnp.max(jnp.abs(out2 - ref2)))

    # TODO(synk): loadParameters (torch.load of a .pt checkpoint) and the
    # importlib-based model selection have no in-kernel equivalent; the inner
    # MainModel is a synthetic MLP with deterministic init.
    print("KERNEL_OK")
</pallas_src>

<mosaic_0001>
module attributes {stable_mosaic.version = 11 : i64} {
  func.func @_mlp_kernel_1d(%arg0: i32, %arg1: memref<8x32xf32, #tpu.memory_space<vmem>>, %arg2: memref<32x128xbf16, #tpu.memory_space<vmem>>, %arg3: memref<1x128xf32, #tpu.memory_space<vmem>>, %arg4: memref<128x128xbf16, #tpu.memory_space<vmem>>, %arg5: memref<1x128xf32, #tpu.memory_space<vmem>>, %arg6: memref<8x128xf32, #tpu.memory_space<vmem>>) attributes {dimension_semantics = [#tpu.dimension_semantics<parallel>], iteration_bounds = array<i64: 1>, scalar_prefetch = 0 : i64, scratch_operands = 0 : i64, tpu.core_type = #tpu.core_type<tc>, window_params = [{transform_indices = @transform_0, window_bounds = array<i64: 8, 32>}, {pipeline_mode = #tpu.pipeline_mode<synchronous>, transform_indices = @transform_1, window_bounds = array<i64: 32, 128>}, {pipeline_mode = #tpu.pipeline_mode<synchronous>, transform_indices = @transform_2, window_bounds = array<i64: 1, 128>}, {pipeline_mode = #tpu.pipeline_mode<synchronous>, transform_indices = @transform_3, window_bounds = array<i64: 128, 128>}, {pipeline_mode = #tpu.pipeline_mode<synchronous>, transform_indices = @transform_4, window_bounds = array<i64: 1, 128>}, {transform_indices = @transform_5, window_bounds = array<i64: 8, 128>}]} {
    %c0 = arith.constant 0 : index
    %c0_0 = arith.constant 0 : index
    %0 = vector.load %arg1[%c0, %c0_0] : memref<8x32xf32, #tpu.memory_space<vmem>>, vector<8x32xf32>
    %1 = arith.truncf %0 : vector<8x32xf32> to vector<8x32xbf16>
    %c0_1 = arith.constant 0 : index
    %c0_2 = arith.constant 0 : index
    %2 = vector.load %arg2[%c0_1, %c0_2] : memref<32x128xbf16, #tpu.memory_space<vmem>>, vector<32x128xbf16>
    %cst = arith.constant dense<0.000000e+00> : vector<8x128xf32>
    %3 = tpu.matmul %1, %2, %cst {dimension_numbers = #tpu.dot_dimension_numbers<[1], [0], [0], [1], [0, 0, 1, 1], [], []>} : vector<8x32xbf16>, vector<32x128xbf16>, vector<8x128xf32> -> vector<8x128xf32>
    %c0_3 = arith.constant 0 : index
    %c0_4 = arith.constant 0 : index
    %4 = vector.load %arg3[%c0_3, %c0_4] : memref<1x128xf32, #tpu.memory_space<vmem>>, vector<1x128xf32>
    %5 = vector.broadcast %4 : vector<1x128xf32> to vector<8x128xf32>
    %6 = arith.addf %3, %5 : vector<8x128xf32>
    %cst_5 = arith.constant 0.000000e+00 : f32
    %7 = vector.broadcast %cst_5 : f32 to vector<8x128xf32>
    %8 = arith.maximumf %6, %7 : vector<8x128xf32>
    %9 = arith.truncf %8 : vector<8x128xf32> to vector<8x128xbf16>
    %c0_6 = arith.constant 0 : index
    %c0_7 = arith.constant 0 : index
    %10 = vector.load %arg4[%c0_6, %c0_7] : memref<128x128xbf16, #tpu.memory_space<vmem>>, vector<128x128xbf16>
    %cst_8 = arith.constant dense<0.000000e+00> : vector<8x128xf32>
    %11 = tpu.matmul %9, %10, %cst_8 {dimension_numbers = #tpu.dot_dimension_numbers<[1], [0], [0], [1], [0, 0, 1, 1], [], []>} : vector<8x128xbf16>, vector<128x128xbf16>, vector<8x128xf32> -> vector<8x128xf32>
    %c0_9 = arith.constant 0 : index
    %c0_10 = arith.constant 0 : index
    %12 = vector.load %arg5[%c0_9, %c0_10] : memref<1x128xf32, #tpu.memory_space<vmem>>, vector<1x128xf32>
    %13 = vector.broadcast %12 : vector<1x128xf32> to vector<8x128xf32>
    %14 = arith.addf %11, %13 : vector<8x128xf32>
    %c0_11 = arith.constant 0 : index
    %c0_12 = arith.constant 0 : index
    %15 = vector.load %arg6[%c0_11, %c0_12] : memref<8x128xf32, #tpu.memory_space<vmem>>, vector<8x128xf32>
    tpu.vector_store %arg6[%c0_11, %c0_12], %14 {strides = array<i32>} : memref<8x128xf32, #tpu.memory_space<vmem>>, vector<8x128xf32>,
    return
  }
  func.func @transform_0(%arg0: i32) -> (i32, i32) {
    %c0_i32 = arith.constant 0 : i32
    %c0_i32_0 = arith.constant 0 : i32
    return %arg0, %c0_i32 : i32, i32
  }
  func.func @transform_1(%arg0: i32) -> (i32, i32) {
    %c0_i32 = arith.constant 0 : i32
    %c0_i32_0 = arith.constant 0 : i32
    %c0_i32_1 = arith.constant 0 : i32
    return %c0_i32, %c0_i32_0 : i32, i32
  }
  func.func @transform_2(%arg0: i32) -> (i32, i32) {
    %c0_i32 = arith.constant 0 : i32
    %c0_i32_0 = arith.constant 0 : i32
    %c0_i32_1 = arith.constant 0 : i32
    return %c0_i32, %c0_i32_0 : i32, i32
  }
  func.func @transform_3(%arg0: i32) -> (i32, i32) {
    %c0_i32 = arith.constant 0 : i32
    %c0_i32_0 = arith.constant 0 : i32
    %c0_i32_1 = arith.constant 0 : i32
    return %c0_i32, %c0_i32_0 : i32, i32
  }
  func.func @transform_4(%arg0: i32) -> (i32, i32) {
    %c0_i32 = arith.constant 0 : i32
    %c0_i32_0 = arith.constant 0 : i32
    %c0_i32_1 = arith.constant 0 : i32
    return %c0_i32, %c0_i32_0 : i32, i32
  }
  func.func @transform_5(%arg0: i32) -> (i32, i32) {
    %c0_i32 = arith.constant 0 : i32
    %c0_i32_0 = arith.constant 0 : i32
    return %arg0, %c0_i32 : i32, i32
  }
}

</mosaic_0001>

<bundles_post_ra>
// kernel: tpu_custom_call.1
= control target key start
LH: loop header
LB: loop body
LE: loop exit
PB: predicated region body
PF: predicated region fallthrough
CT: control target
= control target key end

     0   :  { %10 = vsyncpa [#allocation3], 0  ;;  %s523_s0 = inlined_call_operand.hbm [shape: f32[8,32], index: 0, kind: input, shape index: {}]   ;;  %s524_s1 = inlined_call_operand.hbm [shape: bf16[32,128], index: 1, kind: input, shape index: {}]   ;;  %s525_s2 = inlined_call_operand.vmem [shape: f32[1,128], index: 2, kind: input, shape index: {}]   ;;  %s526_s3 = inlined_call_operand.hbm [shape: bf16[128,128], index: 3, kind: input, shape index: {}]   ;;  %s527_s4 = inlined_call_operand.vmem [shape: f32[1,128], index: 4, kind: input, shape index: {}]   ;;  %s528_s5 = inlined_call_operand.hbm [shape: f32[8,128], index: 5, kind: output, shape index: {}]  }
   0x1   :  { %11 = vsyncpa [#allocation6], 0 }
   0x2   :  { %12 = vsyncpa [#allocation4], 0  ;;  %s425_s18 = smov [#allocation5]   ;;  %s331_s22 = scalar_lea.hbm %s524_s1, 256 }
   0x3   :  { %s28_s19 = sshll.u32 %s425_s18, 4  ;;  %p332_p0 = scmp.ne.s32.totalorder %s524_s1, %s331_s22  ;;  %s29_s19 = int_to_ptr.vmem [resolvable:$true] %s28_s19 }
   0x4   :  { %p335_p1 = scmp.lt.u32.totalorder %s331_s22, %s524_s1 }
   0x6   :  { %p337_p2 = pnand %p335_p1, %p332_p0 }
   0x8   :  { %340 = shalt.err (!%p337_p2)
}
   0x9   :  { %s341_s27 = scalar_lea.vmem %s29_s19, 256  ;;  %p346_p4 = scmp.lt.s32.totalorder %s29_s19, %s29_s19 }
   0xa   :  { %p342_p3 = scmp.ne.s32.totalorder %s29_s19, %s341_s27  ;;  %p347_p5 = scmp.lt.s32.totalorder %s341_s27, %s341_s27 }
   0xc   :  { %p348_p6 = por %p347_p5, %p346_p4 }
   0xe   :  { %p349_p7 = pnand %p348_p6, %p342_p3 }
  0x10   :  { %352 = shalt.err (!%p349_p7)
}
  0x11   :  { %s426_s28 = smov 64   ;;  %s427_s29 = smov 4  }
  0x12   :  { %34 = dma.hbm_to_vmem [thread:$0]  %s524_s1, 256, %s29_s19, [#allocation6], %s426_s28, %s426_s28, %s427_s29  }
  0x13   :  { %s428_s7 = smov [#allocation2]   ;;  %s429_s9 = smov [#allocation7]  }
  0x14   :  { %s19_s8 = sshll.u32 %s428_s7, 4  ;;  %s42_s10 = sshll.u32 %s429_s9, 4  ;;  %s20_s8 = int_to_ptr.vmem [resolvable:$true] %s19_s8  ;;  %s43_s10 = int_to_ptr.vmem [resolvable:$true] %s42_s10 }
  0x15   :  { %s353_s13 = scalar_lea.hbm %s523_s0, 128 }
  0x16   :  { %p354_p8 = scmp.ne.s32.totalorder %s523_s0, %s353_s13  ;;  %p357_p9 = scmp.lt.u32.totalorder %s353_s13, %s523_s0 }
  0x18   :  { %p359_p10 = pnand %p357_p9, %p354_p8 }
  0x1a   :  { %362 = shalt.err (!%p359_p10)
}
  0x1b   :  { %s363_s1 = scalar_lea.vmem %s20_s8, 128  ;;  %p368_p12 = scmp.lt.s32.totalorder %s20_s8, %s20_s8 }
  0x1c   :  { %p364_p11 = scmp.ne.s32.totalorder %s20_s8, %s363_s1  ;;  %p369_p13 = scmp.lt.s32.totalorder %s363_s1, %s363_s1 }
  0x1e   :  { %p370_p0 = por %p369_p13, %p368_p12 }
  0x20   :  { %p371_p1 = pnand %p370_p0, %p364_p11 }
  0x22   :  { %374 = shalt.err (!%p371_p1)
}
  0x23   :  { %22 = dma.hbm_to_vmem [thread:$0]  %s523_s0, 128, %s20_s8, [#allocation3]  }
  0x24   :  { %s375_s22 = scalar_lea.hbm %s526_s3, 1024 }
  0x25   :  { %p376_p2 = scmp.ne.s32.totalorder %s526_s3, %s375_s22  ;;  %p379_p3 = scmp.lt.u32.totalorder %s375_s22, %s526_s3 }
  0x27   :  { %p381_p4 = pnand %p379_p3, %p376_p2 }
  0x29   :  { %384 = shalt.err (!%p381_p4)
}
  0x2a   :  { %s385_s27 = scalar_lea.vmem %s43_s10, 1024  ;;  %p390_p6 = scmp.lt.s32.totalorder %s43_s10, %s43_s10 }
  0x2b   :  { %p386_p5 = scmp.ne.s32.totalorder %s43_s10, %s385_s27  ;;  %p391_p7 = scmp.lt.s32.totalorder %s385_s27, %s385_s27 }
  0x2d   :  { %p392_p8 = por %p391_p7, %p390_p6 }
  0x2f   :  { %p393_p9 = pnand %p392_p8, %p386_p5 }
  0x31   :  { %396 = shalt.err (!%p393_p9)
}
  0x32   :  { %48 = dma.hbm_to_vmem [thread:$0]  %s526_s3, 1024, %s43_s10, [#allocation6], %s426_s28, %s426_s28, %s427_s29  }
  0x33   :  { %419 = dma.done.wait [#allocation3], 128  }
  0x34   :  { %420 = vsyncadd [#allocation3], 4294967168 }
  0x35   :  { %421 = dma.done.wait [#allocation6], 1280  }
  0x36   :  { %422 = vsyncadd [#allocation6], 4294966016  ;;  %v430_v0 = vmov 0.0   ;;  %vm431_vm0 = vmmov 0   ;;  %v321_v1 = vld [vmem:[#allocation5] sm:$0xff]   ;;  %v322_v2 = vld [vmem:[#allocation5 + $0x8] sm:$0xff]  }
  0x37   :  { %285 = vmatprep.subr.bf16.mxu0 %v430_v0  ;;  %289 = vmatprep.mubr.msk.bf16.mxu0 %vm431_vm0, %v430_v0  ;;  %v61_v3 = vld [vmem:[#allocation2] sm:$0xff]  ;;  %v323_v4 = vld [vmem:[#allocation7] sm:$0xff]   ;;  %vm86_vm1 = vcmask 261120   ;;  %v325_v7 = vld [vmem:[#allocation7 + $0x10] sm:$0xff]   ;;  %s432_s7 = smov [#allocation8]  }
  0x38   :  { %293 = vmatprep.subr.bf16.mxu1 %v430_v0  ;;  %309 = vmatprep.mubr.msk.bf16.mxu1 %vm431_vm0, %v430_v0  ;;  %v62_v5 = vpack.c.bf16 %v61_v3, %v61_v3  ;;  %v324_v6 = vld [vmem:[#allocation7 + $0x8] sm:$0xff]   ;;  %v326_v8 = vld [vmem:[#allocation7 + $0x18] sm:$0xff]   ;;  %v327_v9 = vld [vmem:[#allocation7 + $0x20] sm:$0xff]   ;;  %s250_s8 = sshll.u32 %s432_s7, 4  ;;  %s251_s8 = int_to_ptr.vmem [resolvable:$true] %s250_s8 }
  0x39   :  { %286 = vmatpush3.bf16.msra.mxu0 %v321_v1  ;;  %294 = vmatpush3.bf16.msra.mxu1 %v323_v4  ;;  %v328_v10 = vld [vmem:[#allocation7 + $0x28] sm:$0xff]   ;;  %v329_v11 = vld [vmem:[#allocation7 + $0x30] sm:$0xff]   ;;  %v330_v12 = vld [vmem:[#allocation7 + $0x38] sm:$0xff]   ;;  %p402_p11 = scmp.lt.s32.totalorder %s251_s8, %s251_s8 }
  0x3a   :  { %287 = vmatprep.subr.bf16.mxu0 %v430_v0  ;;  %295 = vmatprep.subr.bf16.mxu1 %v430_v0  ;;  %v260_v13 = vld [vmem:[%s525_s2] ss:$0 sm:$0xff]  ;;  %s397_s2 = scalar_lea.vmem %s251_s8, 128 }
  0x3b   :  { %v264_v21 = vld [vmem:[%s527_s4] ss:$0 sm:$0xff]  ;;  %p398_p10 = scmp.ne.s32.totalorder %s251_s8, %s397_s2  ;;  %p403_p12 = scmp.lt.s32.totalorder %s397_s2, %s397_s2 }
  0x3d   :  { %288 = vmatpush3.bf16.msra.mxu0 %v322_v2  ;;  %296 = vmatpush3.bf16.msra.mxu1 %v324_v6  ;;  %p404_p13 = por %p403_p12, %p402_p11 }
  0x3e   :  { %297 = vmatprep.subr.bf16.mxu1 %v430_v0 }
  0x3f   :  { %p405_p0 = pnand %p404_p13, %p398_p10 }
  0x40   :  { %290 = vmatmul.mubr.msk.bf16.vlgmr.msra.gmra.mrb[0].mxu0 %vm86_vm1, %v62_v5 }
  0x41   :  { %298 = vmatpush3.bf16.msra.mxu1 %v325_v7 }
  0x42   :  { %299 = vmatprep.subr.bf16.mxu1 %v430_v0 }
  0x45   :  { %300 = vmatpush3.bf16.msra.mxu1 %v326_v8 }
  0x46   :  { %301 = vmatprep.subr.bf16.mxu1 %v430_v0 }
  0x49   :  { %302 = vmatpush3.bf16.msra.mxu1 %v327_v9 }
  0x4a   :  { %303 = vmatprep.subr.bf16.mxu1 %v430_v0 }
  0x4d   :  { %304 = vmatpush3.bf16.msra.mxu1 %v328_v10 }
  0x4e   :  { %305 = vmatprep.subr.bf16.mxu1 %v430_v0 }
  0x51   :  { %306 = vmatpush3.bf16.msra.mxu1 %v329_v11 }
  0x52   :  { %307 = vmatprep.subr.bf16.mxu1 %v430_v0 }
  0x55   :  { %308 = vmatpush3.bf16.msra.mxu1 %v330_v12 }
 0x113   :  { %v124_v14 = vpop.f32.mrb[0].mxu0 }
 0x114   :  { %v125_v15 = vadd.f32 %v260_v13, %v124_v14  ;;  %v291_v16 = vpop.f32.mrb[1].mxu0 }
 0x115   :  { %v127_v17 = vpop.f32.mrb[2].mxu0 }
 0x116   :  { %v130_v18 = vmax.f32 %v125_v15, 0.0  ;;  %v292_v19 = vpop.f32.mrb[3].mxu0 }
 0x118   :  { %v131_v20 = vpack.c.bf16 %v130_v18, %v130_v18 }
 0x11a   :  { %310 = vmatmul.mubr.bf16.vlgmr.msra.gmra.mrb[0].mxu1 %v131_v20 }
 0x1ed   :  { %v237_v22 = vpop.f32.mrb[0].mxu1 }
 0x1ee   :  { %v238_v23 = vadd.f32 %v264_v21, %v237_v22  ;;  %v311_v24 = vpop.f32.mrb[1].mxu1 }
 0x1ef   :  { %v240_v25 = vpop.f32.mrb[2].mxu1 }
 0x1f0   :  { %243 = vst [vmem:[#allocation8] sm:$0xff] %v238_v23  ;;  %v312_v26 = vpop.f32.mrb[3].mxu1 }
 0x1f1   :  { %408 = shalt.err (!%p405_p0)
}
 0x1f2   :  { %s409_s4 = scalar_lea.hbm %s528_s5, 128 }
 0x1f3   :  { %p410_p1 = scmp.ne.s32.totalorder %s528_s5, %s409_s4  ;;  %p413_p2 = scmp.lt.u32.totalorder %s409_s4, %s528_s5 }
 0x1f5   :  { %p415_p3 = pnand %p413_p2, %p410_p1 }
 0x1f7   :  { %418 = shalt.err (!%p415_p3)
}
 0x1f8   :  { %253 = dma.vmem_to_hbm [thread:$0]  %s251_s8, 128, %s528_s5, [#allocation4]  }
 0x1f9   :  { %423 = dma.done.wait [#allocation4], 128  }
 0x1fa   :  { %424 = vsyncadd [#allocation4], 4294967168 }
 0x1fb   :  { %257 = vsyncpa [#allocation3], 1 }
 0x1fc   :  { %258 = vsyncpa [#allocation6], 1 }
 0x1fd   :  { %259 = vsyncpa [#allocation4], 1 }

</bundles_post_ra>
